<compile_context>
chip_gen: v7x
topology: tpu7x:2x2x1
jax: 0.10.0
libtpu: 0.0.40
codegen_flags: <defaults>
</compile_context>

<pallas_src>
import functools

import jax
import jax.numpy as jnp
from jax.experimental import pallas as pl
from jax.experimental.pallas import tpu as pltpu

GAMMA_NEG = 4.0
GAMMA_POS = 1.0
CLIP = 0.05
EPS = 1e-8

_LANES = 128        # vreg lane width; the flat view is (rows, 128)
_ROW_ALIGN = 32     # row-tile granularity valid for f32 / bf16 / int8 / bool blocks


def _int_pow(base, n):
    """base**n for a non-negative Python int n via repeated multiplies (no EUP)."""
    if n == 0:
        return jnp.ones_like(base)
    result = None
    cur = base
    while n:
        if n & 1:
            result = cur if result is None else result * cur
        n >>= 1
        if n:
            cur = cur * cur
    return result


def _asl_kernel(x_ref, y_ref, out_ref, acc_ref, *,
                gamma_neg, gamma_pos, clip, eps, binary_fast_path, valid_rows):
    p = pl.program_id(0)            # shard axis ("parallel"; OUTER)
    i = pl.program_id(1)            # reduction axis ("arbitrary"; inner)
    steps = pl.num_programs(1)

    # NOTE: this scratch accumulator is shared across the serialized shard
    # axis on 1-TC chips; that is only correct because the shard axis is the
    # OUTER grid dimension (each shard re-zeros at its own i == 0).  Do not
    # reorder the grid axes.
    @pl.when(i == 0)
    def _():
        acc_ref[...] = jnp.zeros_like(acc_ref)

    x = x_ref[...].astype(jnp.float32)
    y = y_ref[...].astype(jnp.float32)

    xs_pos = x
    xs_neg = 1.0 - x
    if clip is not None and clip > 0:
        xs_neg = jnp.minimum(xs_neg + clip, 1.0)

    use_focal = (gamma_neg > 0) or (gamma_pos > 0)
    int_gammas = (float(gamma_neg).is_integer() and float(gamma_pos).is_integer()
                  and gamma_neg >= 0 and gamma_pos >= 0)

    if binary_fast_path:
        # Targets assumed strictly {0, 1}: one select feeds both the single
        # EUP log and the focal base (fewer VALU/EUP ops per element).
        pos = y > 0.5
        pm = jnp.where(pos, xs_pos, xs_neg)
        loss = jnp.log(jnp.maximum(pm, eps))
        if use_focal:
            base = 1.0 - pm
            if int_gammas:
                # Integer powers via multiplies + one select: no EUP power.
                w = jnp.where(pos, _int_pow(base, int(gamma_pos)),
                              _int_pow(base, int(gamma_neg)))
            else:
                w = jnp.power(base, jnp.where(pos, jnp.float32(gamma_pos),
                                              jnp.float32(gamma_neg)))
            loss = loss * w
    else:
        # Exact reference arithmetic (supports soft / fractional labels).
        targets = y
        anti = 1.0 - y
        loss = targets * jnp.log(jnp.maximum(xs_pos, eps))
        loss = loss + anti * jnp.log(jnp.maximum(xs_neg, eps))
        if use_focal:
            exponent = gamma_pos * targets + gamma_neg * anti
            w = jnp.power(1.0 - xs_pos * targets - xs_neg * anti, exponent)
            loss = loss * w

    # Tail masking instead of jnp.pad: rows at/after `valid_rows` (either the
    # stale part of a partial edge block, or an entire block whose index_map
    # was clamped) are zeroed with a SELECT applied AFTER all eps/clip clamps,
    # so garbage can never reach the accumulator.
    tb = loss.shape[0]
    logical_row0 = (p * steps + i) * tb
    row_ids = logical_row0 + jax.lax.broadcasted_iota(jnp.int32, loss.shape, 0)
    loss = jnp.where(row_ids < valid_rows, loss, 0.0)

    # Per-step partial reduce into a single (1, 128) vreg row: no full-tile
    # scratch round-trip, and the big (tb, C) accumulator of the previous
    # version is gone so input tiles can grow.
    acc_ref[...] += jnp.sum(loss, axis=0, keepdims=True)

    # Final step only: one cross-lane reduce, fold in the negation, SMEM store.
    @pl.when(i == steps - 1)
    def _():
        out_ref[0, 0] = -jnp.sum(acc_ref[...])


def _default_num_shards():
    # 2-way megacore sharding only pays on 2-TensorCore chips (v7x); on
    # single-TC v5e / v6e the "parallel" axis serializes, so use 1 shard.
    try:
        kind = jax.devices()[0].device_kind.lower()
    except Exception:
        return 1
    return 2 if "v7" in kind else 1


def asymmetric_loss_optimized(x, y, *, gamma_neg=GAMMA_NEG, gamma_pos=GAMMA_POS,
                              clip=CLIP, eps=EPS, block_rows=None, num_shards=None,
                              assume_binary_targets=True,
                              block_bytes_target=4 * 1024 * 1024):
    """Returns -loss.sum(), matching AsymmetricLossOptimized.forward.

    x, y may be any (matching) shape; the loss is elementwise + a global sum,
    so both are flattened to a lane-dense (rows, 128) view.  y may be passed
    as int8 / bool (and x as bf16) to cut HBM bytes; the kernel upcasts to
    f32.  `assume_binary_targets=True` takes a faster path valid only for
    strictly {0, 1} targets (the module's documented contract); pass False
    for soft / mixup labels.
    """
    assert x.shape == y.shape
    n = 1
    for d in x.shape:
        n *= d
    if n == 0:
        return jnp.zeros((), jnp.float32)

    # ---- lane-dense flat view (rows, 128): full vreg occupancy for any C ----
    xf = x.reshape(-1)
    yf = y.reshape(-1)
    if n % _LANES != 0:
        # Rare tail pad (only when numel isn't a multiple of 128).  Zero x / y
        # contributes exactly 0 to the loss in every path, so no masking is
        # needed for these elements.
        pad = _LANES - n % _LANES
        xf = jnp.pad(xf, (0, pad))
        yf = jnp.pad(yf, (0, pad))
        n += pad
    rows = n // _LANES
    x2 = xf.reshape(rows, _LANES)
    y2 = yf.reshape(rows, _LANES)

    x_item = jnp.dtype(x.dtype).itemsize
    y_item = jnp.dtype(y.dtype).itemsize

    if num_shards is None:
        num_shards = _default_num_shards()
    num_shards = max(1, int(num_shards))

    # ---- row tile: ~block_bytes_target bytes per (widest) input block -------
    if block_rows is None:
        tb = block_bytes_target // (_LANES * max(x_item, y_item))
    else:
        tb = block_rows
    tb = max(_ROW_ALIGN, (int(tb) // _ROW_ALIGN) * _ROW_ALIGN)
    rows_per_shard = pl.cdiv(rows, num_shards)
    tb = min(tb, ((rows_per_shard + _ROW_ALIGN - 1) // _ROW_ALIGN) * _ROW_ALIGN)

    steps = pl.cdiv(rows_per_shard, tb)       # reduction steps per shard
    last_block = pl.cdiv(rows, tb) - 1        # last block that starts in-bounds

    def idx_map(p, i):
        # Clamp so a block never STARTS past the end of the array (redundant
        # clamped blocks are fully zeroed by the in-kernel row mask).
        return (jnp.minimum(p * steps + i, last_block), 0)

    kernel = functools.partial(
        _asl_kernel,
        gamma_neg=float(gamma_neg), gamma_pos=float(gamma_pos),
        clip=clip, eps=float(eps),
        binary_fast_path=bool(assume_binary_targets),
        valid_rows=rows)

    cost = pl.CostEstimate(
        flops=12 * rows * _LANES,
        transcendentals=rows * _LANES,
        bytes_accessed=rows * _LANES * (x_item + y_item) + 4 * num_shards)

    partials = pl.pallas_call(
        kernel,
        out_shape=jax.ShapeDtypeStruct((num_shards, 1), jnp.float32),
        grid_spec=pltpu.PrefetchScalarGridSpec(
            num_scalar_prefetch=0,
            grid=(num_shards, steps),
            in_specs=[pl.BlockSpec((tb, _LANES), idx_map),
                      pl.BlockSpec((tb, _LANES), idx_map)],
            out_specs=pl.BlockSpec((1, 1), lambda p, i: (p, 0),
                                   memory_space=pltpu.SMEM),
            scratch_shapes=[pltpu.VMEM((1, _LANES), jnp.float32)],
        ),
        compiler_params=pltpu.CompilerParams(
            dimension_semantics=("parallel", "arbitrary"),
            vmem_limit_bytes=32 * 1024 * 1024,
        ),
        cost_estimate=cost,
    )(x2, y2)

    # Each shard already stored its negated partial; just sum the shards.
    return jnp.sum(partials)


def _reference(x, y, gamma_neg=GAMMA_NEG, gamma_pos=GAMMA_POS, clip=CLIP, eps=EPS):
    x = x.astype(jnp.float32)
    y = y.astype(jnp.float32)
    xs_pos = x
    xs_neg = 1.0 - x
    if clip is not None and clip > 0:
        xs_neg = jnp.minimum(xs_neg + clip, 1.0)
    loss = y * jnp.log(jnp.maximum(xs_pos, eps))
    loss = loss + (1.0 - y) * jnp.log(jnp.maximum(xs_neg, eps))
    w = jnp.power(1.0 - xs_pos * y - xs_neg * (1.0 - y),
                  gamma_pos * y + gamma_neg * (1.0 - y))
    return -(loss * w).sum()


if __name__ == "__main__":
    key = jax.random.PRNGKey(0)
    kx, ky = jax.random.split(key)

    # Small multi-label shape: batch=16, num_labels=80 (C not a multiple of
    # 128 exercises the lane-dense flattening; B*C = 1280 needs no padding).
    B, C = 16, 80
    # x: probabilities in (0, 1).  This module variant does NOT apply sigmoid
    # in forward (it consumes x directly), so neither does the kernel.
    x = jax.random.uniform(kx, (B, C), dtype=jnp.float32, minval=0.01, maxval=0.99)
    y_f = (jax.random.uniform(ky, (B, C)) > 0.7).astype(jnp.float32)
    y_i8 = y_f.astype(jnp.int8)   # narrow targets: fewer HBM bytes per element

    ref = _reference(x, y_f)

    # Binary fast path with int8 targets.
    out = jax.block_until_ready(asymmetric_loss_optimized(x, y_i8))
    assert jnp.allclose(out, ref, rtol=1e-5, atol=1e-3), (out, ref)

    # General (exact-reference-arithmetic) path with float targets.
    out_general = jax.block_until_ready(
        asymmetric_loss_optimized(x, y_f, assume_binary_targets=False))
    assert jnp.allclose(out_general, ref, rtol=1e-5, atol=1e-3), (out_general, ref)

    # Odd shape: exercises the flat-tail lane pad + in-kernel tail-row masking.
    B2, C2 = 7, 33
    x_odd = jax.random.uniform(kx, (B2, C2), dtype=jnp.float32,
                               minval=0.01, maxval=0.99)
    y_odd = (jax.random.uniform(ky, (B2, C2)) > 0.5).astype(jnp.float32)
    out_odd = jax.block_until_ready(asymmetric_loss_optimized(x_odd, y_odd))
    ref_odd = _reference(x_odd, y_odd)
    assert jnp.allclose(out_odd, ref_odd, rtol=1e-5, atol=1e-3), (out_odd, ref_odd)

    # TODO(synk): disable_torch_grad_focal_loss only affects autograd, not the
    # forward value, so it has no Pallas-forward equivalent.
    print("KERNEL_OK")
</pallas_src>

<mosaic_0001>
module attributes {stable_mosaic.version = 11 : i64} {
  func.func @_asl_kernel(%arg0: i32, %arg1: i32, %arg2: memref<32x128xf32, #tpu.memory_space<vmem>>, %arg3: memref<32x128xi8, #tpu.memory_space<vmem>>, %arg4: memref<1x1xf32, #tpu.memory_space<smem>>, %arg5: memref<1x128xf32, #tpu.memory_space<vmem>>) attributes {dimension_semantics = [#tpu.dimension_semantics<parallel>, #tpu.dimension_semantics<arbitrary>], iteration_bounds = array<i64: 1, 1>, scalar_prefetch = 0 : i64, scratch_operands = 1 : i64, tpu.core_type = #tpu.core_type<tc>, window_params = [{transform_indices = @transform_0, window_bounds = array<i64: 32, 128>}, {transform_indices = @transform_1, window_bounds = array<i64: 32, 128>}, {transform_indices = @transform_2, window_bounds = array<i64: 1, 1>}]} {
    %c0_i32 = arith.constant 0 : i32
    %0 = arith.cmpi eq, %arg1, %c0_i32 : i32
    %1 = arith.extui %0 : i1 to i32
    %c0_i32_0 = arith.constant 0 : i32
    %2 = arith.cmpi ne, %1, %c0_i32_0 : i32
    scf.if %2 {
      %cst_17 = arith.constant 0.000000e+00 : f32
      %42 = vector.broadcast %cst_17 : f32 to vector<1x128xf32>
      %c0_18 = arith.constant 0 : index
      %c0_19 = arith.constant 0 : index
      %43 = vector.load %arg5[%c0_18, %c0_19] : memref<1x128xf32, #tpu.memory_space<vmem>>, vector<1x128xf32>
      tpu.vector_store %arg5[%c0_18, %c0_19], %42 {strides = array<i32>} : memref<1x128xf32, #tpu.memory_space<vmem>>, vector<1x128xf32>,
    } else {
    }
    %c0 = arith.constant 0 : index
    %c0_1 = arith.constant 0 : index
    %3 = vector.load %arg2[%c0, %c0_1] : memref<32x128xf32, #tpu.memory_space<vmem>>, vector<32x128xf32>
    %c0_2 = arith.constant 0 : index
    %c0_3 = arith.constant 0 : index
    %4 = vector.load %arg3[%c0_2, %c0_3] : memref<32x128xi8, #tpu.memory_space<vmem>>, vector<32x128xi8>
    %5 = arith.sitofp %4 : vector<32x128xi8> to vector<32x128xf32>
    %cst = arith.constant 1.000000e+00 : f32
    %6 = vector.broadcast %cst : f32 to vector<32x128xf32>
    %7 = arith.subf %6, %3 : vector<32x128xf32>
    %cst_4 = arith.constant 5.000000e-02 : f32
    %8 = vector.broadcast %cst_4 : f32 to vector<32x128xf32>
    %9 = arith.addf %7, %8 : vector<32x128xf32>
    %cst_5 = arith.constant 1.000000e+00 : f32
    %10 = vector.broadcast %cst_5 : f32 to vector<32x128xf32>
    %11 = arith.minimumf %9, %10 : vector<32x128xf32>
    %cst_6 = arith.constant 5.000000e-01 : f32
    %12 = vector.broadcast %cst_6 : f32 to vector<32x128xf32>
    %13 = arith.cmpf ogt, %5, %12 : vector<32x128xf32>
    %14 = arith.select %13, %3, %11 : vector<32x128xi1>, vector<32x128xf32>
    %cst_7 = arith.constant 9.99999993E-9 : f32
    %15 = vector.broadcast %cst_7 : f32 to vector<32x128xf32>
    %16 = arith.maximumf %14, %15 : vector<32x128xf32>
    %17 = math.log %16 : vector<32x128xf32>
    %cst_8 = arith.constant 1.000000e+00 : f32
    %18 = vector.broadcast %cst_8 : f32 to vector<32x128xf32>
    %19 = arith.subf %18, %14 : vector<32x128xf32>
    %20 = arith.mulf %19, %19 : vector<32x128xf32>
    %21 = arith.mulf %20, %20 : vector<32x128xf32>
    %22 = arith.select %13, %19, %21 : vector<32x128xi1>, vector<32x128xf32>
    %23 = arith.mulf %17, %22 : vector<32x128xf32>
    %c1_i32 = arith.constant 1 : i32
    %24 = arith.muli %arg0, %c1_i32 : i32
    %25 = arith.addi %24, %arg1 : i32
    %c32_i32 = arith.constant 32 : i32
    %26 = arith.muli %25, %c32_i32 : i32
    %27 = tpu.iota {dimensions = array<i32: 0>} : vector<32x128xi32>
    %28 = vector.broadcast %26 : i32 to vector<32x128xi32>
    %29 = arith.addi %28, %27 : vector<32x128xi32>
    %c10_i32 = arith.constant 10 : i32
    %30 = vector.broadcast %c10_i32 : i32 to vector<32x128xi32>
    %31 = arith.cmpi slt, %29, %30 : vector<32x128xi32>
    %cst_9 = arith.constant 0.000000e+00 : f32
    %32 = vector.broadcast %cst_9 : f32 to vector<32x128xf32>
    %33 = arith.select %31, %23, %32 : vector<32x128xi1>, vector<32x128xf32>
    %c0_10 = arith.constant 0 : index
    %c0_11 = arith.constant 0 : index
    %34 = vector.load %arg5[%c0_10, %c0_11] : memref<1x128xf32, #tpu.memory_space<vmem>>, vector<1x128xf32>
    %cst_12 = arith.constant dense<0.000000e+00> : vector<128xf32>
    %35 = vector.multi_reduction <add>, %33, %cst_12 [0] : vector<32x128xf32> to vector<128xf32>
    %36 = vector.shape_cast %35 : vector<128xf32> to vector<1x128xf32>
    %37 = arith.addf %34, %36 : vector<1x128xf32>
    %c0_13 = arith.constant 0 : index
    %c0_14 = arith.constant 0 : index
    %38 = vector.load %arg5[%c0_13, %c0_14] : memref<1x128xf32, #tpu.memory_space<vmem>>, vector<1x128xf32>
    tpu.vector_store %arg5[%c0_13, %c0_14], %37 {strides = array<i32>} : memref<1x128xf32, #tpu.memory_space<vmem>>, vector<1x128xf32>,
    %c0_i32_15 = arith.constant 0 : i32
    %39 = arith.cmpi eq, %arg1, %c0_i32_15 : i32
    %40 = arith.extui %39 : i1 to i32
    %c0_i32_16 = arith.constant 0 : i32
    %41 = arith.cmpi ne, %40, %c0_i32_16 : i32
    scf.if %41 {
      %c0_17 = arith.constant 0 : index
      %c0_18 = arith.constant 0 : index
      %42 = vector.load %arg5[%c0_17, %c0_18] : memref<1x128xf32, #tpu.memory_space<vmem>>, vector<1x128xf32>
      %43 = vector.shape_cast %42 : vector<1x128xf32> to vector<1x1x128xf32>
      %cst_19 = arith.constant dense<0.000000e+00> : vector<1xf32>
      %44 = vector.multi_reduction <add>, %43, %cst_19 [1, 2] : vector<1x1x128xf32> to vector<1xf32>
      %45 = vector.shape_cast %44 : vector<1xf32> to vector<1x1x1xf32>
      %46 = vector.extract %45[0, 0, 0] : f32 from vector<1x1x1xf32>
      %cst_20 = arith.constant 0.000000e+00 : f32
      %47 = arith.subf %cst_20, %46 : f32
      %c0_21 = arith.constant 0 : index
      %c0_22 = arith.constant 0 : index
      %48 = memref.load %arg4[%c0_21, %c0_22] : memref<1x1xf32, #tpu.memory_space<smem>>
      memref.store %47, %arg4[%c0_21, %c0_22] : memref<1x1xf32, #tpu.memory_space<smem>>
    } else {
    }
    return
  }
  func.func @transform_0(%arg0: i32, %arg1: i32) -> (i32, i32) {
    %c1_i32 = arith.constant 1 : i32
    %0 = arith.muli %arg0, %c1_i32 : i32
    %1 = arith.addi %0, %arg1 : i32
    %c0_i32 = arith.constant 0 : i32
    %2 = arith.minsi %1, %c0_i32 : i32
    %c0_i32_0 = arith.constant 0 : i32
    %c0_i32_1 = arith.constant 0 : i32
    return %2, %c0_i32_0 : i32, i32
  }
  func.func @transform_1(%arg0: i32, %arg1: i32) -> (i32, i32) {
    %c1_i32 = arith.constant 1 : i32
    %0 = arith.muli %arg0, %c1_i32 : i32
    %1 = arith.addi %0, %arg1 : i32
    %c0_i32 = arith.constant 0 : i32
    %2 = arith.minsi %1, %c0_i32 : i32
    %c0_i32_0 = arith.constant 0 : i32
    %c0_i32_1 = arith.constant 0 : i32
    return %2, %c0_i32_0 : i32, i32
  }
  func.func @transform_2(%arg0: i32, %arg1: i32) -> (i32, i32) {
    %c0_i32 = arith.constant 0 : i32
    %c0_i32_0 = arith.constant 0 : i32
    return %arg0, %c0_i32 : i32, i32
  }
}

</mosaic_0001>

<bundles_post_ra>
// kernel: tpu_custom_call.1
= control target key start
LH: loop header
LB: loop body
LE: loop exit
PB: predicated region body
PF: predicated region fallthrough
CT: control target
= control target key end

     0   :  { %7 = vsyncpa [#allocation4], 0  ;;  %s355_s0 = inlined_call_operand.hbm [shape: f32[10,128], index: 0, kind: input, shape index: {}]   ;;  %s356_s1 = inlined_call_operand.hbm [shape: s8[10,128], index: 1, kind: input, shape index: {}]   ;;  %s357_s2 = inlined_call_operand.hbm [shape: f32[1,1], index: 2, kind: output, shape index: {}]  }
   0x1   :  { %8 = vsyncpa [#allocation7], 0 }
   0x2   :  { %9 = vsyncpa [#allocation5], 0 }
   0x3   :  { %20 = vsyncadd [#allocation4], 256  ;;  %s292_s9 = smov [#allocation3]   ;;  %s232_s13 = scalar_lea.hbm %s355_s0, 256 }
   0x4   :  { %s25_s10 = sshll.u32 %s292_s9, 4  ;;  %p233_p0 = scmp.ne.s32.totalorder %s355_s0, %s232_s13  ;;  %s26_s10 = int_to_ptr.vmem [resolvable:$true] %s25_s10 }
   0x5   :  { %p236_p1 = scmp.lt.u32.totalorder %s232_s13, %s355_s0 }
   0x7   :  { %p238_p2 = pnand %p236_p1, %p233_p0 }
   0x9   :  { %241 = shalt.err (!%p238_p2)
}
   0xa   :  { %s242_s18 = scalar_lea.vmem %s26_s10, 256  ;;  %s246_s19 = scalar_lea.vmem %s26_s10, 512 }
   0xb   :  { %p243_p3 = scmp.ne.s32.totalorder %s26_s10, %s242_s18  ;;  %p247_p4 = scmp.lt.s32.totalorder %s26_s10, %s26_s10 }
   0xc   :  { %p248_p5 = scmp.lt.s32.totalorder %s246_s19, %s242_s18 }
   0xe   :  { %p249_p6 = por %p248_p5, %p247_p4 }
  0x10   :  { %p250_p7 = pnand %p249_p6, %p243_p3 }
  0x12   :  { %253 = shalt.err (!%p250_p7)
}
  0x13   :  { %s293_s20 = smov 128   ;;  %s294_s21 = smov 8  }
  0x14   :  { %31 = dma.hbm_to_vmem [thread:$0]  %s355_s0, 256, %s26_s10, [#allocation4], %s293_s20, %s293_s20, %s294_s21  }
  0x15   :  { %42 = vsyncadd [#allocation7], 64  ;;  %s295_s24 = smov [#allocation6]   ;;  %s254_s28 = scalar_lea.hbm %s356_s1, 64 }
  0x16   :  { %s47_s25 = sshll.u32 %s295_s24, 4  ;;  %p255_p8 = scmp.ne.s32.totalorder %s356_s1, %s254_s28  ;;  %s48_s25 = int_to_ptr.vmem [resolvable:$true] %s47_s25 }
  0x17   :  { %p258_p9 = scmp.lt.u32.totalorder %s254_s28, %s356_s1 }
  0x19   :  { %p260_p10 = pnand %p258_p9, %p255_p8 }
  0x1b   :  { %263 = shalt.err (!%p260_p10)
}
  0x1c   :  { %s264_s5 = scalar_lea.vmem %s48_s25, 64  ;;  %s268_s0 = scalar_lea.vmem %s48_s25, 128 }
  0x1d   :  { %p265_p11 = scmp.ne.s32.totalorder %s48_s25, %s264_s5  ;;  %p269_p12 = scmp.lt.s32.totalorder %s48_s25, %s48_s25 }
  0x1e   :  { %p270_p13 = scmp.lt.s32.totalorder %s268_s0, %s264_s5 }
  0x20   :  { %p271_p0 = por %p270_p13, %p269_p12 }
  0x22   :  { %p272_p1 = pnand %p271_p0, %p265_p11 }
  0x24   :  { %275 = shalt.err (!%p272_p1)
}
  0x25   :  { %s296_s6 = smov 32   ;;  %s297_s7 = smov 2  }
  0x26   :  { %53 = dma.hbm_to_vmem [thread:$0]  %s356_s1, 64, %s48_s25, [#allocation7], %s296_s6, %s296_s6, %s297_s7  }
  0x27   :  { %286 = dma.done.wait [#allocation4], 512  }
  0x28   :  { %287 = vsyncadd [#allocation4], 4294966784 }
  0x29   :  { %288 = dma.done.wait [#allocation7], 128  }
  0x2a   :  { %289 = vsyncadd [#allocation7], 4294967168  ;;  %v298_v0 = vmov 0.0   ;;  %v77_v1 = vld [vmem:[#allocation3] sm:$0xff]  ;;  %v78_v2 = vld [vmem:[#allocation3 + $0x8] sm:$0xff]  ;;  %v147_v20 = vlaneseq  ;;  %vm181_vm3 = vcmask 1040384  }
  0x2b   :  { %76 = vst [vmem:[#allocation2] sm:$0x1] %v298_v0  ;;  %v215_v3 = vld [vmem:[#allocation6] sm:$0xf]   ;;  %v93_v6 = vsub.f32 1.0, %v77_v1  ;;  %v94_v7 = vsub.f32 1.0, %v78_v2 }
  0x2c   :  { %v216_v4 = vunpack.c.0.s8 %v215_v3  ;;  %v217_v5 = vunpack.c.1.s8 %v215_v3  ;;  %v148_v23 = vshrl.u32 %v147_v20, 7  ;;  %s276_s13 = scalar_lea.hbm %s357_s2, 16 }
  0x2d   :  { %v97_v10 = vadd.f32 0.05, %v93_v6  ;;  %v98_v11 = vadd.f32 0.05, %v94_v7  ;;  %p277_p2 = scmp.ne.s32.totalorder %s357_s2, %s276_s13  ;;  %p280_p3 = scmp.lt.u32.totalorder %s276_s13, %s357_s2 }
  0x2e   :  { %v89_v8 = vcvt.s32.f32 %v216_v4  ;;  %v90_v9 = vcvt.s32.f32 %v217_v5  ;;  %v149_v26 = vadd.s32 8, %v148_v23 }
  0x2f   :  { %v101_v12 = vmin.f32 %v97_v10, 1.0  ;;  %v102_v13 = vmin.f32 %v98_v11, 1.0  ;;  %p282_p4 = pnand %p280_p3, %p277_p2 }
  0x30   :  { %vm105_vm0 = vcmp.gt.f32.partialorder %v89_v8, 0.5  ;;  %vm106_vm1 = vcmp.gt.f32.partialorder %v90_v9, 0.5  ;;  %vm158_vm2 = vcmp.lt.s32.totalorder %v149_v26, 10 }
  0x31   :  { %v109_v14 = vsel %vm105_vm0, %v77_v1, %v101_v12  ;;  %v110_v15 = vsel %vm106_vm1, %v78_v2, %v102_v13 }
  0x32   :  { %v113_v16 = vmax.f32 %v109_v14, 1e-08  ;;  %v114_v17 = vmax.f32 %v110_v15, 1e-08  ;;  %v125_v18 = vsub.f32 1.0, %v109_v14  ;;  %v126_v19 = vsub.f32 1.0, %v110_v15 }
  0x33   :  { %v165_v42 = vld [vmem:[#allocation2] sm:$0x1] }
  0x34   :  { %228 = vlog2.f32 %v113_v16  ;;  %v129_v21 = vmul.f32 %v125_v18, %v125_v18  ;;  %v130_v22 = vmul.f32 %v126_v19, %v126_v19 }
  0x35   :  { %230 = vlog2.f32 %v114_v17 }
  0x36   :  { %v133_v24 = vmul.f32 %v129_v21, %v129_v21  ;;  %v134_v25 = vmul.f32 %v130_v22, %v130_v22 }
  0x38   :  { %v137_v28 = vsel %vm105_vm0, %v125_v18, %v133_v24  ;;  %v138_v31 = vsel %vm106_vm1, %v126_v19, %v134_v25 }
  0x3e   :  { %v229_v27 = vpop.eup %228 }
  0x3f   :  { %v231_v29 = vpop.eup %230  ;;  %v118_v30 = vmul.f32 0.6931472, %v229_v27 }
  0x40   :  { %v120_v32 = vmul.f32 0.6931472, %v231_v29 }
  0x41   :  { %v141_v33 = vmul.f32 %v137_v28, %v118_v30 }
  0x42   :  { %v142_v34 = vmul.f32 %v138_v31, %v120_v32 }
  0x44   :  { %v162_v35 = vsel %vm158_vm2, %v142_v34, 0.0 }
  0x45   :  { %v166_v36 = vadd.f32 %v162_v35, %v141_v33 }
  0x47   :  { %v169_v37 = vrot.slane %v166_v36, 4 }
  0x49   :  { %v170_v38 = vadd.f32 %v169_v37, %v166_v36 }
  0x4b   :  { %v171_v39 = vrot.slane %v170_v38, 2 }
  0x4d   :  { %v172_v40 = vadd.f32 %v171_v39, %v170_v38 }
  0x4f   :  { %v173_v41 = vrot.slane %v172_v40, 1 }
  0x51   :  { %v174_v43 = vadd.f32 %v173_v41, %v172_v40 }
  0x53   :  { %v175_v44 = vadd.f32 %v174_v43, %v165_v42 }
  0x55   :  { %176 = vst [vmem:[#allocation2] sm:$0x1] %v175_v44 }
  0x5c   :  { %v180_v45 = vld [vmem:[#allocation2] sm:$0x1] }
  0x5d   :  { %v182_v46 = vsel %vm181_vm3, %v180_v45, 0.0 }
  0x5e   :  { %183 = vadd.xlane.f32.xlu0 %v182_v46 }
  0xeb   :  { %v184_v47 = vpop.xlane.xlu0 %183 }
  0xec   :  { %v185_v48 = vrot.slane %v184_v47, 4 }
  0xee   :  { %v186_v49 = vadd.f32 %v185_v48, %v184_v47 }
  0xf0   :  { %v187_v50 = vrot.slane %v186_v49, 2 }
  0xf2   :  { %v188_v51 = vadd.f32 %v187_v50, %v186_v49 }
  0xf4   :  { %v189_v52 = vrot.slane %v188_v51, 1 }
  0xf6   :  { %v190_v53 = vadd.f32 %v189_v52, %v188_v51 }
  0xf8   :  { %218 = vpush %v190_v53 }
 0x129   :  { %s219_s1 = spop %218 }
 0x12a   :  { %s192_s10 = ssub.f32 0.0, %s219_s1 }
 0x12c   :  { %194 = sst [smem:[#allocation8]] %s192_s10 }
 0x12d   :  { %285 = shalt.err (!%p282_p4)
}
 0x12e   :  { %s299_s18 = smov [#allocation8]  }
 0x12f   :  { %202 = dma.smem_to_hbm %s299_s18, 16, %s357_s2, [#allocation5]  }
 0x130   :  { %290 = dma.done.wait [#allocation5], 16  }
 0x131   :  { %291 = vsyncadd [#allocation5], 4294967280 }
 0x132   :  { %206 = sfence }
 0x133   :  { %207 = vsyncpa [#allocation4], 1 }
 0x134   :  { %208 = vsyncpa [#allocation7], 1 }
 0x135   :  { %209 = vsyncpa [#allocation5], 1 }

</bundles_post_ra>
